<compile_context>
chip_gen: v5e
topology: v5e:2x2
jax: 0.10.0
libtpu: 0.0.40
codegen_flags: <defaults>
</compile_context>

<pallas_src>
import jax
import jax.numpy as jnp
from jax.experimental import pallas as pl
from jax.experimental.pallas import tpu as pltpu

IN_DIM = 28 * 28      # 784
HID = 128
OUT = 10
OUT_PAD = 128         # lane-dense fc2 width (cols OUT..127 are zero)


def mlp_kernel(x_ref, w1_ref, b1_ref, w2_ref, b2_ref, o_ref):
    # fc1: cast the streamed f32 activations to bf16 in-register (saves a whole
    # wrapper-side HBM cast pass), MXU matmul with f32 accumulation, bias + ReLU on VPU.
    x_bf16 = x_ref[...].astype(jnp.bfloat16)
    h = jnp.dot(x_bf16, w1_ref[...], preferred_element_type=jnp.float32)
    h = jnp.maximum(h + b1_ref[...], 0.0)
    # fc2: bf16 MXU matmul against the zero-padded (128,128) W2, f32 accumulation,
    # lane-dense bf16 store.
    y = jnp.dot(h.astype(w2_ref.dtype), w2_ref[...],
                preferred_element_type=jnp.float32)
    o_ref[...] = (y + b2_ref[...]).astype(o_ref.dtype)


def _round_up(x, m):
    return ((x + m - 1) // m) * m


# Preferred grid-axis semantics: CORE_PARALLEL shards batch tiles across v7x's two
# TensorCores.  "parallel" is the portable fallback (equivalent on 1-TC v5e/v6e).
_PREFERRED_SEMANTICS = getattr(pltpu, "CORE_PARALLEL", "parallel")
_resolved_semantics = None     # lazily resolved on first (eager) call


def simple_net_forward(x, w1, b1, w2p, b2p, *, block_b=1024):
    """x: (B, 1, 28, 28) or (B, 784) float32.
    w1: (784, 128) bf16, b1: (1, 128) f32,
    w2p: (128, 128) bf16 (cols 10..127 zero), b2p: (1, 128) f32 (cols 10..127 zero).
    Returns logits (B, 10) f32 (bf16-accurate: ~1e-2 vs a pure-f32 PyTorch SimpleNet)."""
    global _resolved_semantics

    x2d = x.reshape(-1, IN_DIM)
    B = x2d.shape[0]

    # Balanced batch tiling (multiple of 16 for the bf16 output tiling); pad waste < 16 rows.
    n_tiles = max(1, pl.cdiv(B, block_b))
    TB = _round_up(pl.cdiv(B, n_tiles), 16)
    Bp = _round_up(B, TB)
    if Bp != B:
        # Only triggers for ragged batch sizes; adds at most 15 zero rows.
        x2d = jnp.pad(x2d, ((0, Bp - B), (0, 0)))
    n_blocks = Bp // TB

    flops = 2 * Bp * IN_DIM * HID + 2 * Bp * HID * OUT_PAD
    bytes_accessed = (Bp * IN_DIM * 4           # f32 x stream (cast to bf16 in-kernel)
                      + IN_DIM * HID * 2        # bf16 W1 (resident)
                      + HID * OUT_PAD * 2       # bf16 W2 (resident)
                      + HID * 4 + OUT_PAD * 4   # f32 biases
                      + Bp * OUT_PAD * 2)       # bf16 output slab

    def run(semantics):
        return pl.pallas_call(
            mlp_kernel,
            out_shape=jax.ShapeDtypeStruct((Bp, OUT_PAD), jnp.bfloat16),
            grid_spec=pltpu.PrefetchScalarGridSpec(
                num_scalar_prefetch=0,
                grid=(n_blocks,),
                in_specs=[
                    pl.BlockSpec((TB, IN_DIM), lambda i: (i, 0)),     # x: streamed (f32)
                    pl.BlockSpec((IN_DIM, HID), lambda i: (0, 0)),    # W1: resident
                    pl.BlockSpec((1, HID), lambda i: (0, 0)),         # b1: resident
                    pl.BlockSpec((HID, OUT_PAD), lambda i: (0, 0)),   # W2 (padded): resident
                    pl.BlockSpec((1, OUT_PAD), lambda i: (0, 0)),     # b2 (padded): resident
                ],
                out_specs=pl.BlockSpec((TB, OUT_PAD), lambda i: (i, 0)),
            ),
            compiler_params=pltpu.CompilerParams(
                dimension_semantics=(semantics,)),
            cost_estimate=pl.CostEstimate(
                flops=int(flops), transcendentals=0,
                bytes_accessed=int(bytes_accessed)),
        )(x2d, w1, b1, w2p, b2p)

    if _resolved_semantics is None:
        try:
            out = run(_PREFERRED_SEMANTICS)
            _resolved_semantics = _PREFERRED_SEMANTICS
        except Exception:
            # Portable fallback for generations/toolchains that reject CORE_PARALLEL.
            _resolved_semantics = "parallel"
            out = run(_resolved_semantics)
    else:
        out = run(_resolved_semantics)

    # Tiny (B, 10) slice + upcast; padded cols 10..127 and padded batch rows are dropped.
    return out[:B, :OUT].astype(jnp.float32)


def init_params(key):
    """PyTorch-Linear-style uniform init; weights stored transposed, fc2 zero-padded to 128."""
    k1, k2, k3, k4 = jax.random.split(key, 4)
    bound1 = 1.0 / jnp.sqrt(float(IN_DIM))
    w1 = jax.random.uniform(k1, (IN_DIM, HID), jnp.float32, -bound1, bound1)
    b1 = jax.random.uniform(k2, (1, HID), jnp.float32, -bound1, bound1)
    bound2 = 1.0 / jnp.sqrt(float(HID))
    w2 = jax.random.uniform(k3, (HID, OUT), jnp.float32, -bound2, bound2)
    b2 = jax.random.uniform(k4, (1, OUT), jnp.float32, -bound2, bound2)

    # bf16 weights (halved HBM traffic, native MXU rate); zero-pad fc2 to lane width 128.
    w1_bf16 = w1.astype(jnp.bfloat16)
    w2p = jnp.zeros((HID, OUT_PAD), jnp.bfloat16).at[:, :OUT].set(w2.astype(jnp.bfloat16))
    b2p = jnp.zeros((1, OUT_PAD), jnp.float32).at[:, :OUT].set(b2)
    return w1_bf16, b1, w2p, b2p


if __name__ == "__main__":
    key = jax.random.PRNGKey(0)
    kx, kp = jax.random.split(key)
    # Small MNIST-like batch: (B=8, C=1, H=28, W=28); spatial shape is fixed by the module.
    x = jax.random.normal(kx, (8, 1, 28, 28), jnp.float32)
    w1, b1, w2p, b2p = init_params(kp)

    out = simple_net_forward(x, w1, b1, w2p, b2p)
    out = jax.block_until_ready(out)

    # Pure-JAX reference with matching bf16 casts.
    x2d = x.reshape(-1, IN_DIM)
    xb = x2d.astype(jnp.bfloat16).astype(jnp.float32)
    h = jnp.maximum(xb @ w1.astype(jnp.float32) + b1, 0.0)
    hb = h.astype(jnp.bfloat16).astype(jnp.float32)
    ref = hb @ w2p.astype(jnp.float32)[:, :OUT] + b2p[:, :OUT]

    assert out.shape == (8, OUT) and out.dtype == jnp.float32
    max_err = float(jnp.max(jnp.abs(out - ref)))
    assert max_err < 5e-2, f"max abs err {max_err}"

    print("KERNEL_OK")
</pallas_src>

<mosaic_0001>
module attributes {stable_mosaic.version = 11 : i64} {
  func.func @mlp_kernel(%arg0: i32, %arg1: memref<16x784xf32, #tpu.memory_space<vmem>>, %arg2: memref<784x128xbf16, #tpu.memory_space<vmem>>, %arg3: memref<1x128xf32, #tpu.memory_space<vmem>>, %arg4: memref<128x128xbf16, #tpu.memory_space<vmem>>, %arg5: memref<1x128xf32, #tpu.memory_space<vmem>>, %arg6: memref<16x128xbf16, #tpu.memory_space<vmem>>) attributes {dimension_semantics = [#tpu.dimension_semantics<core_parallel>], iteration_bounds = array<i64: 1>, scalar_prefetch = 0 : i64, scratch_operands = 0 : i64, tpu.core_type = #tpu.core_type<tc>, window_params = [{transform_indices = @transform_0, window_bounds = array<i64: 16, 784>}, {pipeline_mode = #tpu.pipeline_mode<synchronous>, transform_indices = @transform_1, window_bounds = array<i64: 784, 128>}, {pipeline_mode = #tpu.pipeline_mode<synchronous>, transform_indices = @transform_2, window_bounds = array<i64: 1, 128>}, {pipeline_mode = #tpu.pipeline_mode<synchronous>, transform_indices = @transform_3, window_bounds = array<i64: 128, 128>}, {pipeline_mode = #tpu.pipeline_mode<synchronous>, transform_indices = @transform_4, window_bounds = array<i64: 1, 128>}, {transform_indices = @transform_5, window_bounds = array<i64: 16, 128>}]} {
    %c0 = arith.constant 0 : index
    %c0_0 = arith.constant 0 : index
    %0 = vector.load %arg1[%c0, %c0_0] : memref<16x784xf32, #tpu.memory_space<vmem>>, vector<16x784xf32>
    %1 = arith.truncf %0 : vector<16x784xf32> to vector<16x784xbf16>
    %c0_1 = arith.constant 0 : index
    %c0_2 = arith.constant 0 : index
    %2 = vector.load %arg2[%c0_1, %c0_2] : memref<784x128xbf16, #tpu.memory_space<vmem>>, vector<784x128xbf16>
    %cst = arith.constant dense<0.000000e+00> : vector<16x128xf32>
    %3 = tpu.matmul %1, %2, %cst {dimension_numbers = #tpu.dot_dimension_numbers<[1], [0], [0], [1], [0, 0, 1, 1], [], []>} : vector<16x784xbf16>, vector<784x128xbf16>, vector<16x128xf32> -> vector<16x128xf32>
    %c0_3 = arith.constant 0 : index
    %c0_4 = arith.constant 0 : index
    %4 = vector.load %arg3[%c0_3, %c0_4] : memref<1x128xf32, #tpu.memory_space<vmem>>, vector<1x128xf32>
    %5 = vector.broadcast %4 : vector<1x128xf32> to vector<16x128xf32>
    %6 = arith.addf %3, %5 : vector<16x128xf32>
    %cst_5 = arith.constant 0.000000e+00 : f32
    %7 = vector.broadcast %cst_5 : f32 to vector<16x128xf32>
    %8 = arith.maximumf %6, %7 : vector<16x128xf32>
    %9 = arith.truncf %8 : vector<16x128xf32> to vector<16x128xbf16>
    %c0_6 = arith.constant 0 : index
    %c0_7 = arith.constant 0 : index
    %10 = vector.load %arg4[%c0_6, %c0_7] : memref<128x128xbf16, #tpu.memory_space<vmem>>, vector<128x128xbf16>
    %cst_8 = arith.constant dense<0.000000e+00> : vector<16x128xf32>
    %11 = tpu.matmul %9, %10, %cst_8 {dimension_numbers = #tpu.dot_dimension_numbers<[1], [0], [0], [1], [0, 0, 1, 1], [], []>} : vector<16x128xbf16>, vector<128x128xbf16>, vector<16x128xf32> -> vector<16x128xf32>
    %c0_9 = arith.constant 0 : index
    %c0_10 = arith.constant 0 : index
    %12 = vector.load %arg5[%c0_9, %c0_10] : memref<1x128xf32, #tpu.memory_space<vmem>>, vector<1x128xf32>
    %13 = vector.broadcast %12 : vector<1x128xf32> to vector<16x128xf32>
    %14 = arith.addf %11, %13 : vector<16x128xf32>
    %15 = arith.truncf %14 : vector<16x128xf32> to vector<16x128xbf16>
    %c0_11 = arith.constant 0 : index
    %c0_12 = arith.constant 0 : index
    %16 = vector.load %arg6[%c0_11, %c0_12] : memref<16x128xbf16, #tpu.memory_space<vmem>>, vector<16x128xbf16>
    tpu.vector_store %arg6[%c0_11, %c0_12], %15 {strides = array<i32>} : memref<16x128xbf16, #tpu.memory_space<vmem>>, vector<16x128xbf16>,
    return
  }
  func.func @transform_0(%arg0: i32) -> (i32, i32) {
    %c0_i32 = arith.constant 0 : i32
    %c0_i32_0 = arith.constant 0 : i32
    return %arg0, %c0_i32 : i32, i32
  }
  func.func @transform_1(%arg0: i32) -> (i32, i32) {
    %c0_i32 = arith.constant 0 : i32
    %c0_i32_0 = arith.constant 0 : i32
    %c0_i32_1 = arith.constant 0 : i32
    return %c0_i32, %c0_i32_0 : i32, i32
  }
  func.func @transform_2(%arg0: i32) -> (i32, i32) {
    %c0_i32 = arith.constant 0 : i32
    %c0_i32_0 = arith.constant 0 : i32
    %c0_i32_1 = arith.constant 0 : i32
    return %c0_i32, %c0_i32_0 : i32, i32
  }
  func.func @transform_3(%arg0: i32) -> (i32, i32) {
    %c0_i32 = arith.constant 0 : i32
    %c0_i32_0 = arith.constant 0 : i32
    %c0_i32_1 = arith.constant 0 : i32
    return %c0_i32, %c0_i32_0 : i32, i32
  }
  func.func @transform_4(%arg0: i32) -> (i32, i32) {
    %c0_i32 = arith.constant 0 : i32
    %c0_i32_0 = arith.constant 0 : i32
    %c0_i32_1 = arith.constant 0 : i32
    return %c0_i32, %c0_i32_0 : i32, i32
  }
  func.func @transform_5(%arg0: i32) -> (i32, i32) {
    %c0_i32 = arith.constant 0 : i32
    %c0_i32_0 = arith.constant 0 : i32
    return %arg0, %c0_i32 : i32, i32
  }
}

module attributes {stable_mosaic.version = 11 : i64} {
  func.func @mlp_kernel(%arg0: i32, %arg1: memref<16x784xf32, #tpu.memory_space<vmem>>, %arg2: memref<784x128xbf16, #tpu.memory_space<vmem>>, %arg3: memref<1x128xf32, #tpu.memory_space<vmem>>, %arg4: memref<128x128xbf16, #tpu.memory_space<vmem>>, %arg5: memref<1x128xf32, #tpu.memory_space<vmem>>, %arg6: memref<16x128xbf16, #tpu.memory_space<vmem>>) attributes {dimension_semantics = [#tpu.dimension_semantics<parallel>], iteration_bounds = array<i64: 1>, scalar_prefetch = 0 : i64, scratch_operands = 0 : i64, tpu.core_type = #tpu.core_type<tc>, window_params = [{transform_indices = @transform_0, window_bounds = array<i64: 16, 784>}, {pipeline_mode = #tpu.pipeline_mode<synchronous>, transform_indices = @transform_1, window_bounds = array<i64: 784, 128>}, {pipeline_mode = #tpu.pipeline_mode<synchronous>, transform_indices = @transform_2, window_bounds = array<i64: 1, 128>}, {pipeline_mode = #tpu.pipeline_mode<synchronous>, transform_indices = @transform_3, window_bounds = array<i64: 128, 128>}, {pipeline_mode = #tpu.pipeline_mode<synchronous>, transform_indices = @transform_4, window_bounds = array<i64: 1, 128>}, {transform_indices = @transform_5, window_bounds = array<i64: 16, 128>}]} {
    %c0 = arith.constant 0 : index
    %c0_0 = arith.constant 0 : index
    %0 = vector.load %arg1[%c0, %c0_0] : memref<16x784xf32, #tpu.memory_space<vmem>>, vector<16x784xf32>
    %1 = arith.truncf %0 : vector<16x784xf32> to vector<16x784xbf16>
    %c0_1 = arith.constant 0 : index
    %c0_2 = arith.constant 0 : index
    %2 = vector.load %arg2[%c0_1, %c0_2] : memref<784x128xbf16, #tpu.memory_space<vmem>>, vector<784x128xbf16>
    %cst = arith.constant dense<0.000000e+00> : vector<16x128xf32>
    %3 = tpu.matmul %1, %2, %cst {dimension_numbers = #tpu.dot_dimension_numbers<[1], [0], [0], [1], [0, 0, 1, 1], [], []>} : vector<16x784xbf16>, vector<784x128xbf16>, vector<16x128xf32> -> vector<16x128xf32>
    %c0_3 = arith.constant 0 : index
    %c0_4 = arith.constant 0 : index
    %4 = vector.load %arg3[%c0_3, %c0_4] : memref<1x128xf32, #tpu.memory_space<vmem>>, vector<1x128xf32>
    %5 = vector.broadcast %4 : vector<1x128xf32> to vector<16x128xf32>
    %6 = arith.addf %3, %5 : vector<16x128xf32>
    %cst_5 = arith.constant 0.000000e+00 : f32
    %7 = vector.broadcast %cst_5 : f32 to vector<16x128xf32>
    %8 = arith.maximumf %6, %7 : vector<16x128xf32>
    %9 = arith.truncf %8 : vector<16x128xf32> to vector<16x128xbf16>
    %c0_6 = arith.constant 0 : index
    %c0_7 = arith.constant 0 : index
    %10 = vector.load %arg4[%c0_6, %c0_7] : memref<128x128xbf16, #tpu.memory_space<vmem>>, vector<128x128xbf16>
    %cst_8 = arith.constant dense<0.000000e+00> : vector<16x128xf32>
    %11 = tpu.matmul %9, %10, %cst_8 {dimension_numbers = #tpu.dot_dimension_numbers<[1], [0], [0], [1], [0, 0, 1, 1], [], []>} : vector<16x128xbf16>, vector<128x128xbf16>, vector<16x128xf32> -> vector<16x128xf32>
    %c0_9 = arith.constant 0 : index
    %c0_10 = arith.constant 0 : index
    %12 = vector.load %arg5[%c0_9, %c0_10] : memref<1x128xf32, #tpu.memory_space<vmem>>, vector<1x128xf32>
    %13 = vector.broadcast %12 : vector<1x128xf32> to vector<16x128xf32>
    %14 = arith.addf %11, %13 : vector<16x128xf32>
    %15 = arith.truncf %14 : vector<16x128xf32> to vector<16x128xbf16>
    %c0_11 = arith.constant 0 : index
    %c0_12 = arith.constant 0 : index
    %16 = vector.load %arg6[%c0_11, %c0_12] : memref<16x128xbf16, #tpu.memory_space<vmem>>, vector<16x128xbf16>
    tpu.vector_store %arg6[%c0_11, %c0_12], %15 {strides = array<i32>} : memref<16x128xbf16, #tpu.memory_space<vmem>>, vector<16x128xbf16>,
    return
  }
  func.func @transform_0(%arg0: i32) -> (i32, i32) {
    %c0_i32 = arith.constant 0 : i32
    %c0_i32_0 = arith.constant 0 : i32
    return %arg0, %c0_i32 : i32, i32
  }
  func.func @transform_1(%arg0: i32) -> (i32, i32) {
    %c0_i32 = arith.constant 0 : i32
    %c0_i32_0 = arith.constant 0 : i32
    %c0_i32_1 = arith.constant 0 : i32
    return %c0_i32, %c0_i32_0 : i32, i32
  }
  func.func @transform_2(%arg0: i32) -> (i32, i32) {
    %c0_i32 = arith.constant 0 : i32
    %c0_i32_0 = arith.constant 0 : i32
    %c0_i32_1 = arith.constant 0 : i32
    return %c0_i32, %c0_i32_0 : i32, i32
  }
  func.func @transform_3(%arg0: i32) -> (i32, i32) {
    %c0_i32 = arith.constant 0 : i32
    %c0_i32_0 = arith.constant 0 : i32
    %c0_i32_1 = arith.constant 0 : i32
    return %c0_i32, %c0_i32_0 : i32, i32
  }
  func.func @transform_4(%arg0: i32) -> (i32, i32) {
    %c0_i32 = arith.constant 0 : i32
    %c0_i32_0 = arith.constant 0 : i32
    %c0_i32_1 = arith.constant 0 : i32
    return %c0_i32, %c0_i32_0 : i32, i32
  }
  func.func @transform_5(%arg0: i32) -> (i32, i32) {
    %c0_i32 = arith.constant 0 : i32
    %c0_i32_0 = arith.constant 0 : i32
    return %arg0, %c0_i32 : i32, i32
  }
}

</mosaic_0001>

<bundles_post_ra>
// kernel: tpu_custom_call.1
= control target key start
LH: loop header
LB: loop body
LE: loop exit
PB: predicated region body
PF: predicated region fallthrough
CT: control target
= control target key end

     0   :  { %s1158_s18 = sld [smem:[#allocation0]]   ;;  %s1195_s0 = inlined_call_operand.hbm [shape: f32[16,784], index: 0, kind: input, shape index: {}]   ;;  %s1196_s1 = inlined_call_operand.hbm [shape: bf16[784,128], index: 1, kind: input, shape index: {}]   ;;  %s1197_s2 = inlined_call_operand.vmem [shape: f32[1,128], index: 2, kind: input, shape index: {}]   ;;  %s1198_s3 = inlined_call_operand.hbm [shape: bf16[128,128], index: 3, kind: input, shape index: {}]   ;;  %s1199_s4 = inlined_call_operand.vmem [shape: f32[1,128], index: 4, kind: input, shape index: {}]   ;;  %s1200_s5 = inlined_call_operand.hbm [shape: bf16[16,128], index: 5, kind: output, shape index: {}]  }
   0x1   :  { %10 = vsyncpa [#allocation3], 0 }
   0x2   :  { %11 = vsyncpa [#allocation6], 0  ;;  %s34_s21 = sshll.u32 %s1196_s1, 4  ;;  %s35_s21 = int_to_ptr.hbm [resolvable:$true] %s34_s21 }
   0x3   :  { %12 = vsyncpa [#allocation4], 0  ;;  %s1120_s22 = smov [#allocation5]   ;;  %s1121_s25 = smov 64  }
   0x4   :  { %s36_s23 = sshll.u32 %s1120_s22, 4  ;;  %s1122_s26 = smov 4   ;;  %s37_s23 = int_to_ptr.vmem [resolvable:$true] %s36_s23 }
   0x5   :  { %42 = dma.hbm_to_vmem [thread:$0]  %s35_s21, 6272, %s37_s23, [#allocation6], %s1121_s25, %s1121_s25, %s1122_s26  }
   0x6   :  { %s1007_s24 = smul.u32 112, %s1158_s18  ;;  %s1123_s6 = smov [#allocation2]  }
   0x7   :  { %s23_s1 = sshll.u32 %s1123_s6, 4  ;;  %s1046_s11 = scalar_lea.hbm %s1195_s0, 112  ;;  %s24_s1 = int_to_ptr.vmem [resolvable:$true] %s23_s1 }
   0x8   :  { %s20_s29 = scalar_lea.hbm %s1195_s0, %s1007_s24 }
   0x9   :  { %s21_s30 = sshll.u32 %s20_s29, 4  ;;  %s22_s30 = int_to_ptr.hbm [resolvable:$true] %s21_s30 }
   0xa   :  { %s1042_s7 = sshra.s32 %s22_s30, 4  ;;  %s1043_s7 = int_to_ptr.hbm [resolvable:$true] %s1042_s7 }
   0xb   :  { %s1044_s8 = scalar_lea.hbm %s1043_s7, 112 }
   0xc   :  { %p1045_p0 = scmp.ne.s32.totalorder %s1043_s7, %s1044_s8  ;;  %p1048_p1 = scmp.lt.s32.totalorder %s1046_s11, %s1044_s8 }
   0xe   :  { %p1050_p2 = pnand %p1048_p1, %p1045_p0 }
  0x10   :  { %1053 = shalt.err (!%p1050_p2)
}
  0x11   :  { %s1124_s12 = smov 896   ;;  %s1125_s13 = smov 56  }
  0x12   :  { %29 = dma.hbm_to_vmem [thread:$0]  %s22_s30, 1792, %s24_s1, [#allocation3], %s1124_s12, %s1124_s12, %s1125_s13  }
  0x13   :  { %s49_s16 = sshll.u32 %s1198_s3, 4  ;;  %s1126_s17 = smov [#allocation7]   ;;  %s50_s16 = int_to_ptr.hbm [resolvable:$true] %s49_s16 }
  0x14   :  { %s51_s19 = sshll.u32 %s1126_s17, 4  ;;  %s52_s19 = int_to_ptr.vmem [resolvable:$true] %s51_s19 }
  0x15   :  { %57 = dma.hbm_to_vmem [thread:$0]  %s50_s16, 1024, %s52_s19, [#allocation6], %s1121_s25, %s1121_s25, %s1122_s26  }
  0x16   :  { %1114 = dma.done.wait [#allocation3], 1792  }
  0x17   :  { %1115 = vsyncadd [#allocation3], 4294965504 }
  0x18   :  { %1116 = dma.done.wait [#allocation6], 7296  }
  0x19   :  { %1117 = vsyncadd [#allocation6], 4294960000  ;;  %v951_v0 = vld [vmem:[#allocation5 + $0x38] sm:$0xff]  ;;  %v950_v4 = vld [vmem:[#allocation5 + $0x30] sm:$0xff]  ;;  %vm492_vm0 = vcmask 130048   ;;  %s1127_s27 = smov [#allocation8]  }
  0x1a   :  { %v959_v1 = vld [vmem:[#allocation5 + $0x78] sm:$0xff]  ;;  %496 = vmatpush.bf16.msra.mxu0 %v951_v0  ;;  %v958_v5 = vld [vmem:[#allocation5 + $0x70] sm:$0xff]  ;;  %v949_v8 = vld [vmem:[#allocation5 + $0x28] sm:$0xff]  ;;  %s690_s28 = sshll.u32 %s1127_s27, 4  ;;  %s1106_s1 = scalar_lea.hbm %s1200_s5, 8  ;;  %s691_s28 = int_to_ptr.vmem [resolvable:$true] %s690_s28 }
  0x1b   :  { %v967_v2 = vld [vmem:[#allocation5 + $0xb8] sm:$0xff]  ;;  %510 = vmatpush.bf16.msra.mxu1 %v959_v1  ;;  %v966_v6 = vld [vmem:[#allocation5 + $0xb0] sm:$0xff]  ;;  %v957_v9 = vld [vmem:[#allocation5 + $0x68] sm:$0xff] }
  0x1c   :  { %v975_v3 = vld [vmem:[#allocation5 + $0xf8] sm:$0xff]  ;;  %524 = vmatpush.bf16.msra.mxu2 %v967_v2  ;;  %v974_v7 = vld [vmem:[#allocation5 + $0xf0] sm:$0xff]  ;;  %v965_v10 = vld [vmem:[#allocation5 + $0xa8] sm:$0xff] }
  0x1d   :  { %538 = vmatpush.bf16.msra.mxu3 %v975_v3  ;;  %v973_v11 = vld [vmem:[#allocation5 + $0xe8] sm:$0xff]  ;;  %v948_v12 = vld [vmem:[#allocation5 + $0x20] sm:$0xff]  ;;  %v947_v16 = vld [vmem:[#allocation5 + $0x18] sm:$0xff] }
  0x1e   :  { %497 = vmatpush.bf16.msra.mxu0 %v950_v4  ;;  %v956_v13 = vld [vmem:[#allocation5 + $0x60] sm:$0xff]  ;;  %v955_v17 = vld [vmem:[#allocation5 + $0x58] sm:$0xff]  ;;  %v946_v20 = vld [vmem:[#allocation5 + $0x10] sm:$0xff] }
  0x1f   :  { %511 = vmatpush.bf16.msra.mxu1 %v958_v5  ;;  %v964_v14 = vld [vmem:[#allocation5 + $0xa0] sm:$0xff]  ;;  %v963_v18 = vld [vmem:[#allocation5 + $0x98] sm:$0xff]  ;;  %v954_v21 = vld [vmem:[#allocation5 + $0x50] sm:$0xff] }
  0x20   :  { %525 = vmatpush.bf16.msra.mxu2 %v966_v6  ;;  %v972_v15 = vld [vmem:[#allocation5 + $0xe0] sm:$0xff]  ;;  %v971_v19 = vld [vmem:[#allocation5 + $0xd8] sm:$0xff]  ;;  %v962_v22 = vld [vmem:[#allocation5 + $0x90] sm:$0xff] }
  0x21   :  { %539 = vmatpush.bf16.msra.mxu3 %v974_v7  ;;  %v970_v23 = vld [vmem:[#allocation5 + $0xd0] sm:$0xff]  ;;  %v945_v24 = vld [vmem:[#allocation5 + $0x8] sm:$0xff]  ;;  %v944_v28 = vld [vmem:[#allocation5] sm:$0xff] }
  0x22   :  { %498 = vmatpush.bf16.msra.mxu0 %v949_v8  ;;  %v953_v25 = vld [vmem:[#allocation5 + $0x48] sm:$0xff]  ;;  %v952_v29 = vld [vmem:[#allocation5 + $0x40] sm:$0xff]  ;;  %v75_v30 = vld [vmem:[#allocation2] sm:$0xff] }
  0x23   :  { %512 = vmatpush.bf16.msra.mxu1 %v957_v9  ;;  %v961_v26 = vld [vmem:[#allocation5 + $0x88] sm:$0xff]  ;;  %v76_v32 = vld [vmem:[#allocation2 + $0x8] sm:$0xff]  ;;  %v83_v33 = vld [vmem:[#allocation2 + $0x40] sm:$0xff] }
  0x24   :  { %526 = vmatpush.bf16.msra.mxu2 %v965_v10  ;;  %v969_v27 = vld [vmem:[#allocation5 + $0xc8] sm:$0xff]  ;;  %v983_v34 = vld [vmem:[#allocation5 + $0x138] sm:$0xff]  ;;  %v960_v36 = vld [vmem:[#allocation5 + $0x80] sm:$0xff]  ;;  %v90_v43 = vpack.c.bf16 %v83_v33, %v76_v32 }
  0x25   :  { %540 = vmatpush.bf16.msra.mxu3 %v973_v11  ;;  %v82_v31 = vld [vmem:[#allocation2 + $0x38] sm:$0xff]  ;;  %v991_v35 = vld [vmem:[#allocation5 + $0x178] sm:$0xff]  ;;  %v968_v37 = vld [vmem:[#allocation5 + $0xc0] sm:$0xff] }
  0x26   :  { %499 = vmatpush.bf16.msra.mxu0 %v948_v12  ;;  %v77_v38 = vld [vmem:[#allocation2 + $0x10] sm:$0xff]  ;;  %v84_v39 = vld [vmem:[#allocation2 + $0x48] sm:$0xff]  ;;  %v89_v40 = vpack.c.bf16 %v82_v31, %v75_v30  ;;  %v78_v41 = vld [vmem:[#allocation2 + $0x18] sm:$0xff] }
  0x27   :  { %513 = vmatpush.bf16.msra.mxu1 %v956_v13  ;;  %v85_v42 = vld [vmem:[#allocation2 + $0x50] sm:$0xff]  ;;  %v982_v45 = vld [vmem:[#allocation5 + $0x130] sm:$0xff]  ;;  %v91_v47 = vpack.c.bf16 %v84_v39, %v77_v38  ;;  %v981_v49 = vld [vmem:[#allocation5 + $0x128] sm:$0xff] }
  0x28   :  { %527 = vmatpush.bf16.msra.mxu2 %v964_v14  ;;  %v992_v44 = vld [vmem:[#allocation5 + $0x180] sm:$0xff]  ;;  %v990_v46 = vld [vmem:[#allocation5 + $0x170] sm:$0xff]  ;;  %v92_v48 = vpack.c.bf16 %v85_v42, %v78_v41  ;;  %v989_v50 = vld [vmem:[#allocation5 + $0x168] sm:$0xff] }
  0x29   :  { %541 = vmatpush.bf16.msra.mxu3 %v972_v15  ;;  %v980_v51 = vld [vmem:[#allocation5 + $0x120] sm:$0xff]  ;;  %v979_v53 = vld [vmem:[#allocation5 + $0x118] sm:$0xff]  ;;  %v978_v57 = vld [vmem:[#allocation5 + $0x110] sm:$0xff] }
  0x2a   :  { %500 = vmatpush.bf16.msra.mxu0 %v947_v16  ;;  %v988_v52 = vld [vmem:[#allocation5 + $0x160] sm:$0xff]  ;;  %v987_v54 = vld [vmem:[#allocation5 + $0x158] sm:$0xff]  ;;  %v986_v58 = vld [vmem:[#allocation5 + $0x150] sm:$0xff] }
  0x2b   :  { %514 = vmatpush.bf16.msra.mxu1 %v955_v17  ;;  %v81_v55 = vld [vmem:[#allocation2 + $0x30] sm:$0xff]  ;;  %v88_v56 = vld [vmem:[#allocation2 + $0x68] sm:$0xff]  ;;  %v977_v60 = vld [vmem:[#allocation5 + $0x108] sm:$0xff] }
  0x2c   :  { %528 = vmatpush.bf16.msra.mxu2 %v963_v18  ;;  %v95_v59 = vpack.c.bf16 %v88_v56, %v81_v55  ;;  %v985_v61 = vld [vmem:[#allocation5 + $0x148] sm:$0xff]  ;;  %v976_v62 = vld [vmem:[#allocation5 + $0x100] sm:$0xff]  ;;  %v79_v0 = vld [vmem:[#allocation2 + $0x20] sm:$0xff] }
  0x2d   :  { %542 = vmatpush.bf16.msra.mxu3 %v971_v19  ;;  %v984_v63 = vld [vmem:[#allocation5 + $0x140] sm:$0xff]  ;;  %v86_v1 = vld [vmem:[#allocation2 + $0x58] sm:$0xff]  ;;  %v80_v2 = vld [vmem:[#allocation2 + $0x28] sm:$0xff] }
  0x2e   :  { %501 = vmatpush.bf16.msra.mxu0 %v946_v20  ;;  %v87_v3 = vld [vmem:[#allocation2 + $0x60] sm:$0xff]  ;;  %v93_v4 = vpack.c.bf16 %v86_v1, %v79_v0  ;;  %v1000_v6 = vld [vmem:[#allocation7 + $0x38] sm:$0xff]  ;;  %v999_v7 = vld [vmem:[#allocation7 + $0x30] sm:$0xff] }
  0x2f   :  { %515 = vmatpush.bf16.msra.mxu1 %v954_v21  ;;  %v94_v5 = vpack.c.bf16 %v87_v3, %v80_v2  ;;  %v998_v8 = vld [vmem:[#allocation7 + $0x28] sm:$0xff]  ;;  %v997_v9 = vld [vmem:[#allocation7 + $0x20] sm:$0xff]  ;;  %v996_v10 = vld [vmem:[#allocation7 + $0x18] sm:$0xff] }
  0x30   :  { %529 = vmatpush.bf16.msra.mxu2 %v962_v22  ;;  %v995_v11 = vld [vmem:[#allocation7 + $0x10] sm:$0xff]  ;;  %v994_v12 = vld [vmem:[#allocation7 + $0x8] sm:$0xff]  ;;  %v993_v16 = vld [vmem:[#allocation7] sm:$0xff] }
  0x31   :  { %543 = vmatpush.bf16.msra.mxu3 %v970_v23  ;;  %v1016_v17 = vld [vmem:[%s1197_s2] ss:$0 sm:$0xff]  ;;  %s1001_s2 = sshll.u32 %s1158_s18, 3 }
  0x32   :  { %502 = vmatpush.bf16.msra.mxu0 %v945_v24  ;;  %s689_s24 = scalar_lea.hbm %s1200_s5, %s1001_s2 }
  0x33   :  { %516 = vmatpush.bf16.msra.mxu1 %v953_v25  ;;  %s692_s29 = sshll.u32 %s689_s24, 4  ;;  %s693_s29 = int_to_ptr.hbm [resolvable:$true] %s692_s29 }
  0x34   :  { %530 = vmatpush.bf16.msra.mxu2 %v961_v26  ;;  %s1102_s30 = sshra.s32 %s693_s29, 4  ;;  %s1103_s30 = int_to_ptr.hbm [resolvable:$true] %s1102_s30 }
  0x35   :  { %544 = vmatpush.bf16.msra.mxu3 %v969_v27  ;;  %s1104_s18 = scalar_lea.hbm %s1103_s30, 8 }
  0x36   :  { %503 = vmatpush.bf16.msra.mxu0 %v944_v28  ;;  %p1105_p3 = scmp.ne.s32.totalorder %s1103_s30, %s1104_s18  ;;  %p1108_p4 = scmp.lt.s32.totalorder %s1106_s1, %s1104_s18 }
  0x37   :  { %517 = vmatpush.bf16.msra.mxu1 %v952_v29 }
  0x38   :  { %531 = vmatpush.bf16.msra.mxu2 %v960_v36  ;;  %p1110_p5 = pnand %p1108_p4, %p1105_p3 }
  0x39   :  { %545 = vmatpush.bf16.msra.mxu3 %v968_v37  ;;  %504 = vmatmul.bf16.vlgmr.msra.gmra.mxu0 %v89_v40 }
  0x3a   :  { %552 = vmatpush.bf16.msrb.mxu0 %v983_v34  ;;  %518 = vmatmul.bf16.vlgmr.msra.gmra.mxu1 %v90_v43 }
  0x3b   :  { %566 = vmatpush.bf16.msrb.mxu1 %v991_v35  ;;  %532 = vmatmul.bf16.vlgmr.msra.gmra.mxu2 %v91_v47  ;;  %v1017_v47 = vld [vmem:[%s1199_s4] ss:$0 sm:$0xff] }
  0x3c   :  { %587 = vmatpush.bf16.msrb.mxu2 %v992_v44  ;;  %546 = vmatmul.bf16.vlgmr.msra.gmra.mxu3 %v92_v48 }
  0x3d   :  { %665 = vmatpush.bf16.msrb.mxu3 %v1000_v6 }
  0x3e   :  { %553 = vmatpush.bf16.msrb.mxu0 %v982_v45 }
  0x3f   :  { %567 = vmatpush.bf16.msrb.mxu1 %v990_v46 }
  0x41   :  { %666 = vmatpush.bf16.msrb.mxu3 %v999_v7 }
  0x42   :  { %554 = vmatpush.bf16.msrb.mxu0 %v981_v49 }
  0x43   :  { %568 = vmatpush.bf16.msrb.mxu1 %v989_v50 }
  0x45   :  { %667 = vmatpush.bf16.msrb.mxu3 %v998_v8 }
  0x46   :  { %555 = vmatpush.bf16.msrb.mxu0 %v980_v51 }
  0x47   :  { %569 = vmatpush.bf16.msrb.mxu1 %v988_v52 }
  0x49   :  { %668 = vmatpush.bf16.msrb.mxu3 %v997_v9 }
  0x4a   :  { %556 = vmatpush.bf16.msrb.mxu0 %v979_v53 }
  0x4b   :  { %570 = vmatpush.bf16.msrb.mxu1 %v987_v54  ;;  %909 = vmatmul.msk.bf16.vlgmr.msrb.gmra.mxu2 %vm492_vm0, %v95_v59 }
  0x4d   :  { %669 = vmatpush.bf16.msrb.mxu3 %v996_v10 }
  0x4e   :  { %557 = vmatpush.bf16.msrb.mxu0 %v978_v57 }
  0x4f   :  { %571 = vmatpush.bf16.msrb.mxu1 %v986_v58 }
  0x51   :  { %670 = vmatpush.bf16.msrb.mxu3 %v995_v11 }
  0x52   :  { %558 = vmatpush.bf16.msrb.mxu0 %v977_v60 }
  0x53   :  { %572 = vmatpush.bf16.msrb.mxu1 %v985_v61 }
  0x55   :  { %671 = vmatpush.bf16.msrb.mxu3 %v994_v12 }
  0x56   :  { %559 = vmatpush.bf16.msrb.mxu0 %v976_v62 }
  0x57   :  { %573 = vmatpush.bf16.msrb.mxu1 %v984_v63 }
  0x59   :  { %560 = vmatmul.bf16.vlgmr.msrb.gmra.mxu0 %v93_v4  ;;  %672 = vmatpush.bf16.msrb.mxu3 %v993_v16 }
  0x5a   :  { %574 = vmatmul.bf16.vlgmr.msrb.gmra.mxu1 %v94_v5 }
  0xb6   :  { %v505_v13 = vpop.f32.mrf.mxu0 }
  0xb7   :  { %v519_v14 = vpop.f32.mrf.mxu1  ;;  %v506_v18 = vadd.f32 %v1016_v17, %v505_v13 }
  0xb9   :  { %v520_v22 = vadd.f32 %v519_v14, %v506_v18 }
  0xbe   :  { %v533_v15 = vpop.f32.mrf.mxu2  ;;  %v507_v19 = vpop.f32.mrf.mxu0 }
  0xbf   :  { %v521_v20 = vpop.f32.mrf.mxu1  ;;  %v547_v23 = vpop.f32.mrf.mxu3  ;;  %v508_v24 = vadd.f32 %v1016_v17, %v507_v19  ;;  %v534_v25 = vadd.f32 %v533_v15, %v520_v22 }
  0xc1   :  { %v522_v26 = vadd.f32 %v521_v20, %v508_v24  ;;  %v548_v29 = vadd.f32 %v547_v23, %v534_v25 }
  0xc6   :  { %v535_v21 = vpop.f32.mrf.mxu2 }
  0xc7   :  { %v536_v31 = vadd.f32 %v535_v21, %v522_v26  ;;  %v549_v33 = vpop.f32.mrf.mxu3 }
  0xc9   :  { %v550_v34 = vadd.f32 %v549_v33, %v536_v31 }
  0xce   :  { %v589_v30 = vpop.f32.mrf.mxu2 }
  0xd6   :  { %v561_v27 = vpop.f32.mrf.mxu0  ;;  %v591_v41 = vpop.f32.mrf.mxu2 }
  0xd7   :  { %v575_v28 = vpop.f32.mrf.mxu1  ;;  %v562_v32 = vadd.f32 %v561_v27, %v548_v29 }
  0xd9   :  { %v576_v35 = vadd.f32 %v575_v28, %v562_v32 }
  0xdb   :  { %v590_v39 = vadd.f32 %v589_v30, %v576_v35 }
  0xdd   :  { %v594_v43 = vmax.f32 %v590_v39, 0.0 }
  0xde   :  { %v563_v36 = vpop.f32.mrf.mxu0 }
  0xdf   :  { %v564_v37 = vadd.f32 %v563_v36, %v550_v34  ;;  %v577_v38 = vpop.f32.mrf.mxu1 }
  0xe1   :  { %v578_v40 = vadd.f32 %v577_v38, %v564_v37 }
  0xe3   :  { %v592_v42 = vadd.f32 %v591_v41, %v578_v40 }
  0xe5   :  { %v595_v44 = vmax.f32 %v592_v42, 0.0 }
  0xe7   :  { %v596_v45 = vpack.c.bf16 %v595_v44, %v594_v43 }
  0xe9   :  { %673 = vmatmul.bf16.vlgmr.msrb.gmra.mxu3 %v596_v45 }
 0x16c   :  { %v674_v46 = vpop.f32.mrf.mxu3 }
 0x16d   :  { %v675_v49 = vadd.f32 %v1017_v47, %v674_v46 }
 0x174   :  { %v676_v48 = vpop.f32.mrf.mxu3 }
 0x175   :  { %v677_v50 = vadd.f32 %v1017_v47, %v676_v48 }
 0x177   :  { %v1005_v51 = vpack.c.bf16 %v677_v50, %v675_v49 }
 0x179   :  { %1006 = vst [vmem:[#allocation8] sm:$0xff] %v1005_v51  }
 0x17a   :  { %1113 = shalt.err (!%p1110_p5)
}
 0x17b   :  { %698 = dma.vmem_to_hbm [thread:$0]  %s691_s28, 128, %s693_s29, [#allocation4], %s1121_s25, %s1121_s25, %s1122_s26  }
 0x17c   :  { %1118 = dma.done.wait [#allocation4], 128  }
 0x17d   :  { %1119 = vsyncadd [#allocation4], 4294967168 }
 0x17e   :  { %703 = vsyncpa [#allocation3], 1 }
 0x17f   :  { %704 = vsyncpa [#allocation6], 1 }
 0x180   :  { %705 = vsyncpa [#allocation4], 1 }

// kernel: tpu_custom_call.1
= control target key start
LH: loop header
LB: loop body
LE: loop exit
PB: predicated region body
PF: predicated region fallthrough
CT: control target
= control target key end

     0   :  { %10 = vsyncpa [#allocation3], 0  ;;  %s1165_s0 = inlined_call_operand.hbm [shape: f32[16,784], index: 0, kind: input, shape index: {}]   ;;  %s1166_s1 = inlined_call_operand.hbm [shape: bf16[784,128], index: 1, kind: input, shape index: {}]   ;;  %s1167_s2 = inlined_call_operand.vmem [shape: f32[1,128], index: 2, kind: input, shape index: {}]   ;;  %s1168_s3 = inlined_call_operand.hbm [shape: bf16[128,128], index: 3, kind: input, shape index: {}]   ;;  %s1169_s4 = inlined_call_operand.vmem [shape: f32[1,128], index: 4, kind: input, shape index: {}]   ;;  %s1170_s5 = inlined_call_operand.hbm [shape: bf16[16,128], index: 5, kind: output, shape index: {}]  }
   0x1   :  { %11 = vsyncpa [#allocation6], 0  ;;  %s30_s20 = sshll.u32 %s1166_s1, 4  ;;  %s31_s20 = int_to_ptr.hbm [resolvable:$true] %s30_s20 }
   0x2   :  { %12 = vsyncpa [#allocation4], 0  ;;  %s1100_s21 = smov [#allocation5]   ;;  %s17_s25 = sshll.u32 %s1165_s0, 4  ;;  %s18_s25 = int_to_ptr.hbm [resolvable:$true] %s17_s25 }
   0x3   :  { %s32_s22 = sshll.u32 %s1100_s21, 4  ;;  %s1101_s26 = smov 64   ;;  %s33_s22 = int_to_ptr.vmem [resolvable:$true] %s32_s22 }
   0x4   :  { %s1102_s27 = smov 4   ;;  %s1103_s28 = smov [#allocation2]  }
   0x5   :  { %38 = dma.hbm_to_vmem [thread:$0]  %s31_s20, 6272, %s33_s22, [#allocation6], %s1101_s26, %s1101_s26, %s1102_s27  }
   0x6   :  { %s19_s29 = sshll.u32 %s1103_s28, 4  ;;  %s1104_s1 = smov 896   ;;  %s20_s29 = int_to_ptr.vmem [resolvable:$true] %s19_s29 }
   0x7   :  { %s1105_s30 = smov 56   ;;  %s45_s8 = sshll.u32 %s1168_s3, 4  ;;  %s46_s8 = int_to_ptr.hbm [resolvable:$true] %s45_s8 }
   0x8   :  { %25 = dma.hbm_to_vmem [thread:$0]  %s18_s25, 1792, %s20_s29, [#allocation3], %s1104_s1, %s1104_s1, %s1105_s30  }
   0x9   :  { %s1106_s9 = smov [#allocation7]  }
   0xa   :  { %s47_s0 = sshll.u32 %s1106_s9, 4  ;;  %s48_s0 = int_to_ptr.vmem [resolvable:$true] %s47_s0 }
   0xb   :  { %53 = dma.hbm_to_vmem [thread:$0]  %s46_s8, 1024, %s48_s0, [#allocation6], %s1101_s26, %s1101_s26, %s1102_s27  }
   0xc   :  { %1094 = dma.done.wait [#allocation3], 1792  }
   0xd   :  { %1095 = vsyncadd [#allocation3], 4294965504 }
   0xe   :  { %1096 = dma.done.wait [#allocation6], 7296  }
   0xf   :  { %1097 = vsyncadd [#allocation6], 4294960000  ;;  %v933_v0 = vld [vmem:[#allocation5 + $0x38] sm:$0xff]  ;;  %v932_v4 = vld [vmem:[#allocation5 + $0x30] sm:$0xff]  ;;  %vm486_vm0 = vcmask 130048   ;;  %s1107_s12 = smov [#allocation8]  }
  0x10   :  { %v941_v1 = vld [vmem:[#allocation5 + $0x78] sm:$0xff]  ;;  %490 = vmatpush.bf16.msra.mxu0 %v933_v0  ;;  %v940_v5 = vld [vmem:[#allocation5 + $0x70] sm:$0xff]  ;;  %v931_v8 = vld [vmem:[#allocation5 + $0x28] sm:$0xff]  ;;  %s681_s13 = sshll.u32 %s1107_s12, 4  ;;  %s683_s16 = sshll.u32 %s1170_s5, 4  ;;  %s682_s13 = int_to_ptr.vmem [resolvable:$true] %s681_s13  ;;  %s684_s16 = int_to_ptr.hbm [resolvable:$true] %s683_s16 }
  0x11   :  { %v949_v2 = vld [vmem:[#allocation5 + $0xb8] sm:$0xff]  ;;  %504 = vmatpush.bf16.msra.mxu1 %v941_v1  ;;  %v948_v6 = vld [vmem:[#allocation5 + $0xb0] sm:$0xff]  ;;  %v939_v9 = vld [vmem:[#allocation5 + $0x68] sm:$0xff] }
  0x12   :  { %v957_v3 = vld [vmem:[#allocation5 + $0xf8] sm:$0xff]  ;;  %518 = vmatpush.bf16.msra.mxu2 %v949_v2  ;;  %v956_v7 = vld [vmem:[#allocation5 + $0xf0] sm:$0xff]  ;;  %v947_v10 = vld [vmem:[#allocation5 + $0xa8] sm:$0xff] }
  0x13   :  { %532 = vmatpush.bf16.msra.mxu3 %v957_v3  ;;  %v955_v11 = vld [vmem:[#allocation5 + $0xe8] sm:$0xff]  ;;  %v930_v12 = vld [vmem:[#allocation5 + $0x20] sm:$0xff]  ;;  %v929_v16 = vld [vmem:[#allocation5 + $0x18] sm:$0xff] }
  0x14   :  { %491 = vmatpush.bf16.msra.mxu0 %v932_v4  ;;  %v938_v13 = vld [vmem:[#allocation5 + $0x60] sm:$0xff]  ;;  %v937_v17 = vld [vmem:[#allocation5 + $0x58] sm:$0xff]  ;;  %v928_v20 = vld [vmem:[#allocation5 + $0x10] sm:$0xff] }
  0x15   :  { %505 = vmatpush.bf16.msra.mxu1 %v940_v5  ;;  %v946_v14 = vld [vmem:[#allocation5 + $0xa0] sm:$0xff]  ;;  %v945_v18 = vld [vmem:[#allocation5 + $0x98] sm:$0xff]  ;;  %v936_v21 = vld [vmem:[#allocation5 + $0x50] sm:$0xff] }
  0x16   :  { %519 = vmatpush.bf16.msra.mxu2 %v948_v6  ;;  %v954_v15 = vld [vmem:[#allocation5 + $0xe0] sm:$0xff]  ;;  %v953_v19 = vld [vmem:[#allocation5 + $0xd8] sm:$0xff]  ;;  %v944_v22 = vld [vmem:[#allocation5 + $0x90] sm:$0xff] }
  0x17   :  { %533 = vmatpush.bf16.msra.mxu3 %v956_v7  ;;  %v952_v23 = vld [vmem:[#allocation5 + $0xd0] sm:$0xff]  ;;  %v927_v24 = vld [vmem:[#allocation5 + $0x8] sm:$0xff]  ;;  %v926_v28 = vld [vmem:[#allocation5] sm:$0xff] }
  0x18   :  { %492 = vmatpush.bf16.msra.mxu0 %v931_v8  ;;  %v935_v25 = vld [vmem:[#allocation5 + $0x48] sm:$0xff]  ;;  %v934_v29 = vld [vmem:[#allocation5 + $0x40] sm:$0xff]  ;;  %v69_v30 = vld [vmem:[#allocation2] sm:$0xff] }
  0x19   :  { %506 = vmatpush.bf16.msra.mxu1 %v939_v9  ;;  %v943_v26 = vld [vmem:[#allocation5 + $0x88] sm:$0xff]  ;;  %v70_v32 = vld [vmem:[#allocation2 + $0x8] sm:$0xff]  ;;  %v77_v33 = vld [vmem:[#allocation2 + $0x40] sm:$0xff] }
  0x1a   :  { %520 = vmatpush.bf16.msra.mxu2 %v947_v10  ;;  %v951_v27 = vld [vmem:[#allocation5 + $0xc8] sm:$0xff]  ;;  %v965_v34 = vld [vmem:[#allocation5 + $0x138] sm:$0xff]  ;;  %v942_v36 = vld [vmem:[#allocation5 + $0x80] sm:$0xff]  ;;  %v84_v43 = vpack.c.bf16 %v77_v33, %v70_v32 }
  0x1b   :  { %534 = vmatpush.bf16.msra.mxu3 %v955_v11  ;;  %v76_v31 = vld [vmem:[#allocation2 + $0x38] sm:$0xff]  ;;  %v973_v35 = vld [vmem:[#allocation5 + $0x178] sm:$0xff]  ;;  %v950_v37 = vld [vmem:[#allocation5 + $0xc0] sm:$0xff] }
  0x1c   :  { %493 = vmatpush.bf16.msra.mxu0 %v930_v12  ;;  %v71_v38 = vld [vmem:[#allocation2 + $0x10] sm:$0xff]  ;;  %v78_v39 = vld [vmem:[#allocation2 + $0x48] sm:$0xff]  ;;  %v83_v40 = vpack.c.bf16 %v76_v31, %v69_v30  ;;  %v72_v41 = vld [vmem:[#allocation2 + $0x18] sm:$0xff] }
  0x1d   :  { %507 = vmatpush.bf16.msra.mxu1 %v938_v13  ;;  %v79_v42 = vld [vmem:[#allocation2 + $0x50] sm:$0xff]  ;;  %v964_v45 = vld [vmem:[#allocation5 + $0x130] sm:$0xff]  ;;  %v85_v47 = vpack.c.bf16 %v78_v39, %v71_v38  ;;  %v963_v49 = vld [vmem:[#allocation5 + $0x128] sm:$0xff] }
  0x1e   :  { %521 = vmatpush.bf16.msra.mxu2 %v946_v14  ;;  %v974_v44 = vld [vmem:[#allocation5 + $0x180] sm:$0xff]  ;;  %v972_v46 = vld [vmem:[#allocation5 + $0x170] sm:$0xff]  ;;  %v86_v48 = vpack.c.bf16 %v79_v42, %v72_v41  ;;  %v971_v50 = vld [vmem:[#allocation5 + $0x168] sm:$0xff] }
  0x1f   :  { %535 = vmatpush.bf16.msra.mxu3 %v954_v15  ;;  %v962_v51 = vld [vmem:[#allocation5 + $0x120] sm:$0xff]  ;;  %v961_v53 = vld [vmem:[#allocation5 + $0x118] sm:$0xff]  ;;  %v960_v57 = vld [vmem:[#allocation5 + $0x110] sm:$0xff] }
  0x20   :  { %494 = vmatpush.bf16.msra.mxu0 %v929_v16  ;;  %v970_v52 = vld [vmem:[#allocation5 + $0x160] sm:$0xff]  ;;  %v969_v54 = vld [vmem:[#allocation5 + $0x158] sm:$0xff]  ;;  %v968_v58 = vld [vmem:[#allocation5 + $0x150] sm:$0xff] }
  0x21   :  { %508 = vmatpush.bf16.msra.mxu1 %v937_v17  ;;  %v75_v55 = vld [vmem:[#allocation2 + $0x30] sm:$0xff]  ;;  %v82_v56 = vld [vmem:[#allocation2 + $0x68] sm:$0xff]  ;;  %v959_v60 = vld [vmem:[#allocation5 + $0x108] sm:$0xff] }
  0x22   :  { %522 = vmatpush.bf16.msra.mxu2 %v945_v18  ;;  %v89_v59 = vpack.c.bf16 %v82_v56, %v75_v55  ;;  %v967_v61 = vld [vmem:[#allocation5 + $0x148] sm:$0xff]  ;;  %v958_v62 = vld [vmem:[#allocation5 + $0x100] sm:$0xff]  ;;  %v73_v0 = vld [vmem:[#allocation2 + $0x20] sm:$0xff] }
  0x23   :  { %536 = vmatpush.bf16.msra.mxu3 %v953_v19  ;;  %v966_v63 = vld [vmem:[#allocation5 + $0x140] sm:$0xff]  ;;  %v80_v1 = vld [vmem:[#allocation2 + $0x58] sm:$0xff]  ;;  %v74_v2 = vld [vmem:[#allocation2 + $0x28] sm:$0xff] }
  0x24   :  { %495 = vmatpush.bf16.msra.mxu0 %v928_v20  ;;  %v81_v3 = vld [vmem:[#allocation2 + $0x60] sm:$0xff]  ;;  %v87_v4 = vpack.c.bf16 %v80_v1, %v73_v0  ;;  %v982_v6 = vld [vmem:[#allocation7 + $0x38] sm:$0xff]  ;;  %v981_v7 = vld [vmem:[#allocation7 + $0x30] sm:$0xff] }
  0x25   :  { %509 = vmatpush.bf16.msra.mxu1 %v936_v21  ;;  %v88_v5 = vpack.c.bf16 %v81_v3, %v74_v2  ;;  %v980_v8 = vld [vmem:[#allocation7 + $0x28] sm:$0xff]  ;;  %v979_v9 = vld [vmem:[#allocation7 + $0x20] sm:$0xff]  ;;  %v978_v10 = vld [vmem:[#allocation7 + $0x18] sm:$0xff] }
  0x26   :  { %523 = vmatpush.bf16.msra.mxu2 %v944_v22  ;;  %v977_v11 = vld [vmem:[#allocation7 + $0x10] sm:$0xff]  ;;  %v976_v12 = vld [vmem:[#allocation7 + $0x8] sm:$0xff]  ;;  %v975_v16 = vld [vmem:[#allocation7] sm:$0xff] }
  0x27   :  { %537 = vmatpush.bf16.msra.mxu3 %v952_v23  ;;  %v996_v17 = vld [vmem:[%s1167_s2] ss:$0 sm:$0xff] }
  0x28   :  { %496 = vmatpush.bf16.msra.mxu0 %v927_v24 }
  0x29   :  { %510 = vmatpush.bf16.msra.mxu1 %v935_v25 }
  0x2a   :  { %524 = vmatpush.bf16.msra.mxu2 %v943_v26 }
  0x2b   :  { %538 = vmatpush.bf16.msra.mxu3 %v951_v27 }
  0x2c   :  { %497 = vmatpush.bf16.msra.mxu0 %v926_v28 }
  0x2d   :  { %511 = vmatpush.bf16.msra.mxu1 %v934_v29 }
  0x2e   :  { %525 = vmatpush.bf16.msra.mxu2 %v942_v36 }
  0x2f   :  { %539 = vmatpush.bf16.msra.mxu3 %v950_v37  ;;  %498 = vmatmul.bf16.vlgmr.msra.gmra.mxu0 %v83_v40 }
  0x30   :  { %546 = vmatpush.bf16.msrb.mxu0 %v965_v34  ;;  %512 = vmatmul.bf16.vlgmr.msra.gmra.mxu1 %v84_v43 }
  0x31   :  { %560 = vmatpush.bf16.msrb.mxu1 %v973_v35  ;;  %526 = vmatmul.bf16.vlgmr.msra.gmra.mxu2 %v85_v47  ;;  %v997_v47 = vld [vmem:[%s1169_s4] ss:$0 sm:$0xff] }
  0x32   :  { %581 = vmatpush.bf16.msrb.mxu2 %v974_v44  ;;  %540 = vmatmul.bf16.vlgmr.msra.gmra.mxu3 %v86_v48 }
  0x33   :  { %659 = vmatpush.bf16.msrb.mxu3 %v982_v6 }
  0x34   :  { %547 = vmatpush.bf16.msrb.mxu0 %v964_v45 }
  0x35   :  { %561 = vmatpush.bf16.msrb.mxu1 %v972_v46 }
  0x37   :  { %660 = vmatpush.bf16.msrb.mxu3 %v981_v7 }
  0x38   :  { %548 = vmatpush.bf16.msrb.mxu0 %v963_v49 }
  0x39   :  { %562 = vmatpush.bf16.msrb.mxu1 %v971_v50 }
  0x3b   :  { %661 = vmatpush.bf16.msrb.mxu3 %v980_v8 }
  0x3c   :  { %549 = vmatpush.bf16.msrb.mxu0 %v962_v51 }
  0x3d   :  { %563 = vmatpush.bf16.msrb.mxu1 %v970_v52 }
  0x3f   :  { %662 = vmatpush.bf16.msrb.mxu3 %v979_v9 }
  0x40   :  { %550 = vmatpush.bf16.msrb.mxu0 %v961_v53 }
  0x41   :  { %564 = vmatpush.bf16.msrb.mxu1 %v969_v54  ;;  %893 = vmatmul.msk.bf16.vlgmr.msrb.gmra.mxu2 %vm486_vm0, %v89_v59 }
  0x43   :  { %663 = vmatpush.bf16.msrb.mxu3 %v978_v10 }
  0x44   :  { %551 = vmatpush.bf16.msrb.mxu0 %v960_v57 }
  0x45   :  { %565 = vmatpush.bf16.msrb.mxu1 %v968_v58 }
  0x47   :  { %664 = vmatpush.bf16.msrb.mxu3 %v977_v11 }
  0x48   :  { %552 = vmatpush.bf16.msrb.mxu0 %v959_v60 }
  0x49   :  { %566 = vmatpush.bf16.msrb.mxu1 %v967_v61 }
  0x4b   :  { %665 = vmatpush.bf16.msrb.mxu3 %v976_v12 }
  0x4c   :  { %553 = vmatpush.bf16.msrb.mxu0 %v958_v62 }
  0x4d   :  { %567 = vmatpush.bf16.msrb.mxu1 %v966_v63 }
  0x4f   :  { %554 = vmatmul.bf16.vlgmr.msrb.gmra.mxu0 %v87_v4  ;;  %666 = vmatpush.bf16.msrb.mxu3 %v975_v16 }
  0x50   :  { %568 = vmatmul.bf16.vlgmr.msrb.gmra.mxu1 %v88_v5 }
  0xac   :  { %v499_v13 = vpop.f32.mrf.mxu0 }
  0xad   :  { %v513_v14 = vpop.f32.mrf.mxu1  ;;  %v500_v18 = vadd.f32 %v996_v17, %v499_v13 }
  0xaf   :  { %v514_v22 = vadd.f32 %v513_v14, %v500_v18 }
  0xb4   :  { %v527_v15 = vpop.f32.mrf.mxu2  ;;  %v501_v19 = vpop.f32.mrf.mxu0 }
  0xb5   :  { %v515_v20 = vpop.f32.mrf.mxu1  ;;  %v541_v23 = vpop.f32.mrf.mxu3  ;;  %v502_v24 = vadd.f32 %v996_v17, %v501_v19  ;;  %v528_v25 = vadd.f32 %v527_v15, %v514_v22 }
  0xb7   :  { %v516_v26 = vadd.f32 %v515_v20, %v502_v24  ;;  %v542_v29 = vadd.f32 %v541_v23, %v528_v25 }
  0xbc   :  { %v529_v21 = vpop.f32.mrf.mxu2 }
  0xbd   :  { %v530_v31 = vadd.f32 %v529_v21, %v516_v26  ;;  %v543_v33 = vpop.f32.mrf.mxu3 }
  0xbf   :  { %v544_v34 = vadd.f32 %v543_v33, %v530_v31 }
  0xc4   :  { %v583_v30 = vpop.f32.mrf.mxu2 }
  0xcc   :  { %v555_v27 = vpop.f32.mrf.mxu0  ;;  %v585_v41 = vpop.f32.mrf.mxu2 }
  0xcd   :  { %v569_v28 = vpop.f32.mrf.mxu1  ;;  %v556_v32 = vadd.f32 %v555_v27, %v542_v29 }
  0xcf   :  { %v570_v35 = vadd.f32 %v569_v28, %v556_v32 }
  0xd1   :  { %v584_v39 = vadd.f32 %v583_v30, %v570_v35 }
  0xd3   :  { %v588_v43 = vmax.f32 %v584_v39, 0.0 }
  0xd4   :  { %v557_v36 = vpop.f32.mrf.mxu0 }
  0xd5   :  { %v558_v37 = vadd.f32 %v557_v36, %v544_v34  ;;  %v571_v38 = vpop.f32.mrf.mxu1 }
  0xd7   :  { %v572_v40 = vadd.f32 %v571_v38, %v558_v37 }
  0xd9   :  { %v586_v42 = vadd.f32 %v585_v41, %v572_v40 }
  0xdb   :  { %v589_v44 = vmax.f32 %v586_v42, 0.0 }
  0xdd   :  { %v590_v45 = vpack.c.bf16 %v589_v44, %v588_v43 }
  0xdf   :  { %667 = vmatmul.bf16.vlgmr.msrb.gmra.mxu3 %v590_v45 }
 0x162   :  { %v668_v46 = vpop.f32.mrf.mxu3 }
 0x163   :  { %v669_v49 = vadd.f32 %v997_v47, %v668_v46 }
 0x16a   :  { %v670_v48 = vpop.f32.mrf.mxu3 }
 0x16b   :  { %v671_v50 = vadd.f32 %v997_v47, %v670_v48 }
 0x16d   :  { %v986_v51 = vpack.c.bf16 %v671_v50, %v669_v49 }
 0x16f   :  { %987 = vst [vmem:[#allocation8] sm:$0xff] %v986_v51  }
 0x170   :  { %689 = dma.vmem_to_hbm [thread:$0]  %s682_s13, 128, %s684_s16, [#allocation4], %s1101_s26, %s1101_s26, %s1102_s27  }
 0x171   :  { %1098 = dma.done.wait [#allocation4], 128  }
 0x172   :  { %1099 = vsyncadd [#allocation4], 4294967168 }
 0x173   :  { %694 = vsyncpa [#allocation3], 1 }
 0x174   :  { %695 = vsyncpa [#allocation6], 1 }
 0x175   :  { %696 = vsyncpa [#allocation4], 1 }

</bundles_post_ra>
